<compile_context>
chip_gen: v7x
topology: tpu7x:2x2x1
jax: 0.10.0
libtpu: 0.0.40
codegen_flags: <defaults>
</compile_context>

<pallas_src>
import functools

import jax
import jax.numpy as jnp
from jax.experimental import pallas as pl
from jax.experimental.pallas import tpu as pltpu


# -----------------------------------------------------------------------------
# Fused kernel: quantize_conv (1x1) -> VectorQuantizer -> quantize_deconv (1x1)
# -----------------------------------------------------------------------------
def _generator_fused_kernel(x_ref, wq_ref, bq_ref, e_ref, e2_ref,
                            ghi_ref, glo_ref, zq_ref, xd_ref, sse_ref):
    """One (batch, spatial-tile) step of the fused Generator forward.

    Spatial positions live in the LANE axis, channels in the sublane axis.

    x_ref  : (C, T)     bf16  activation tile (spatial-in-lanes)
    wq_ref : (D, C)     bf16  quantize_conv weight
    bq_ref : (D, 1)     f32   quantize_conv bias (broadcast over lanes)
    e_ref  : (K, D)     bf16  VQ codebook (for the distance matmul)
    e2_ref : (K, 1)     f32   precomputed |e_k|^2
    ghi_ref: (D+C, K)   bf16  hi half of [E^T ; (E Wd^T + bd)^T]
    glo_ref: (D+C, K)   bf16  lo half (f32 residual) of the same matrix
    zq_ref : (D, T)     f32   quantized latents (straight-through fwd value)
    xd_ref : (C, T)     f32   quantize_deconv output
    sse_ref: (1, T)     f32   per-position sum_d (zq - z)^2
    """
    x = x_ref[...]                                                       # (C, T) bf16

    # quantize_conv: 1x1 conv == Wq @ X + bq   (bf16 MXU, f32 accumulation)
    z = jnp.dot(wq_ref[...], x, preferred_element_type=jnp.float32) + bq_ref[...]   # (D, T)

    # Nearest codebook entry: argmin_k (|z_t|^2 + |e_k|^2 - 2 e_k.z_t)
    #   == argmin_k (|e_k|^2 - 2 e_k.z_t)  (the |z_t|^2 term is constant per column).
    ze = jnp.dot(e_ref[...], z.astype(jnp.bfloat16),
                 preferred_element_type=jnp.float32)                     # (K, T)
    dist = e2_ref[...] - 2.0 * ze                                        # (K, T)
    kk, tt = dist.shape
    dmin = jnp.min(dist, axis=0, keepdims=True)                          # (1, T)
    iota_k = jax.lax.broadcasted_iota(jnp.int32, (kk, tt), 0)
    # first index attaining the minimum (argmin with tie -> lowest index)
    idx = jnp.min(jnp.where(dist <= dmin, iota_k, kk), axis=0, keepdims=True)   # (1, T)
    onehot = (iota_k == idx).astype(jnp.bfloat16)                        # (K, T), exact 0/1

    # One gather produces BOTH the quantized latent and the deconv output:
    #   gathered[:, t] = [E^T ; (E Wd^T + bd)^T][:, idx_t]
    # via a hi/lo bf16 split of the f32 gather matrix (near-exact f32; the
    # onehot columns select exactly one row, so accumulation is exact).
    gathered = (jnp.dot(ghi_ref[...], onehot, preferred_element_type=jnp.float32)
                + jnp.dot(glo_ref[...], onehot, preferred_element_type=jnp.float32))  # (D+C, T)

    d = zq_ref.shape[0]
    zq = gathered[:d, :]                                                 # (D, T)
    zq_ref[...] = zq
    xd_ref[...] = gathered[d:, :]                                        # (C, T)

    # Partial VQ loss: per-position sum over D of (zq - z)^2 (sublane-only
    # reduction, lane-dense write); final reduction happens in the wrapper.
    diff = zq - z
    sse_ref[...] = jnp.sum(diff * diff, axis=0, keepdims=True)


def fused_generator_call(x_all, wq_bf16, bq, e_bf16, e2, g_hi, g_lo,
                         *, tile_lanes=1024):
    """x_all: (N, C, HW) bf16 activations, spatial-in-lanes, src+tgt stacked on N."""
    n, c, hw = x_all.shape
    k, d = e_bf16.shape
    dc = g_hi.shape[0]

    # Spatial tile (lane) size: full image if it fits, else a multiple of 128.
    t_tile = hw if hw <= tile_lanes else tile_lanes
    grid_t = pl.cdiv(hw, t_tile)
    grid = (n, grid_t)

    def const(shape):
        return pl.BlockSpec(shape, lambda b, t: (0, 0))

    # Advisory cost estimate so XLA schedules the (cheap) wrapper glue around us.
    flops = 2 * n * hw * (c * d + d * k + 2 * k * dc)
    bytes_accessed = (x_all.size * 2                     # bf16 activations in
                      + n * hw * (d + c + 1) * 4         # f32 outputs
                      + (wq_bf16.size + e_bf16.size + g_hi.size + g_lo.size) * 2
                      + (bq.size + e2.size) * 4)

    return pl.pallas_call(
        _generator_fused_kernel,
        out_shape=(
            jax.ShapeDtypeStruct((n, d, hw), jnp.float32),   # zq
            jax.ShapeDtypeStruct((n, c, hw), jnp.float32),   # quantize_deconv output
            jax.ShapeDtypeStruct((n, 1, hw), jnp.float32),   # per-position SSE
        ),
        grid_spec=pltpu.PrefetchScalarGridSpec(
            num_scalar_prefetch=0,
            grid=grid,
            in_specs=[
                pl.BlockSpec((None, c, t_tile), lambda b, t: (b, 0, t)),  # stream x
                const((d, c)),        # wq   (VMEM-resident)
                const((d, 1)),        # bq
                const((k, d)),        # codebook (bf16, distance matmul)
                const((k, 1)),        # |e_k|^2
                const((dc, k)),       # gather matrix hi
                const((dc, k)),       # gather matrix lo
            ],
            out_specs=(
                pl.BlockSpec((None, d, t_tile), lambda b, t: (b, 0, t)),
                pl.BlockSpec((None, c, t_tile), lambda b, t: (b, 0, t)),
                pl.BlockSpec((None, 1, t_tile), lambda b, t: (b, 0, t)),
            ),
        ),
        compiler_params=pltpu.CompilerParams(
            # Both axes are independent -> shard across v7x's two TensorCores.
            dimension_semantics=("parallel", "parallel"),
            # Explicit scoped-VMEM budget (v5e default is only 16 MiB); re-sweep
            # together with tile_lanes for production codebook sizes.
            vmem_limit_bytes=32 * 1024 * 1024,
        ),
        cost_estimate=pl.CostEstimate(flops=flops, transcendentals=0,
                                      bytes_accessed=bytes_accessed),
    )(x_all, wq_bf16, bq, e_bf16, e2, g_hi, g_lo)


# -----------------------------------------------------------------------------
# Parameters
# -----------------------------------------------------------------------------
class GeneratorParams:
    def __init__(self, key, c_dim, embed_dim, n_embed, style_dim, beta):
        self.c_dim, self.embed_dim = c_dim, embed_dim
        self.n_embed, self.style_dim, self.beta = n_embed, style_dim, beta
        k = jax.random.split(key, 4)
        # kaiming_normal fan_in (a=0) for 1x1 convs, zero bias
        std_q = (2.0 / c_dim) ** 0.5
        std_d = (2.0 / embed_dim) ** 0.5
        self.w_qconv = jax.random.normal(k[0], (embed_dim, c_dim), jnp.float32) * std_q
        self.b_qconv = jnp.zeros((embed_dim,), jnp.float32)
        self.w_dconv = jax.random.normal(k[1], (c_dim, embed_dim), jnp.float32) * std_d
        self.b_dconv = jnp.zeros((c_dim,), jnp.float32)
        # style_fc parameters (Linear + LeakyReLU(0.2)).
        # TODO(synk): hyperDecoder is not defined in the provided source, so the
        # style branch is dead code in this forward; its matmul is deferred
        # until a real decoder consumes it.
        lim = 1.0 / (style_dim ** 0.5)
        self.w_style = jax.random.uniform(k[2], (style_dim, style_dim), jnp.float32,
                                          minval=-lim, maxval=lim)
        self.b_style = jnp.zeros((style_dim,), jnp.float32)
        # VQ codebook: uniform(-1/n_embed, 1/n_embed)
        self.codebook = jax.random.uniform(k[3], (n_embed, embed_dim), jnp.float32,
                                           minval=-1.0 / n_embed, maxval=1.0 / n_embed)


# -----------------------------------------------------------------------------
# Generator forward (single fused pallas_call; zero boundary transposes)
# -----------------------------------------------------------------------------
def generator_forward(params, x_src, x_tgt, s_src, s_tgt, *, tile_lanes=1024):
    bsz, c, h, w = x_src.shape
    hw = h * w
    d = params.embed_dim

    # TODO(synk): Encoder sub-module is not defined in the provided source; identity.
    # NCHW already has spatial minor / channel major, so the spatial-in-lanes
    # layout is a pure reshape: no transposes.  src and tgt batches are stacked
    # so one fused kernel handles both encode+quantize+decode passes, and the
    # activations are streamed as bf16 (half the input DMA bytes).
    x_all = (jnp.concatenate([x_src, x_tgt], axis=0)
             .reshape(2 * bsz, c, hw).astype(jnp.bfloat16))              # (2B, C, HW)

    # Constant operands, precomputed once and kept VMEM-resident in the kernel.
    wq = params.w_qconv.astype(jnp.bfloat16)                             # (D, C)
    bq = params.b_qconv.reshape(d, 1)                                    # (D, 1)
    e_f32 = params.codebook                                              # (K, D)
    e_bf16 = e_f32.astype(jnp.bfloat16)
    e2 = jnp.sum(e_f32 * e_f32, axis=1, keepdims=True)                   # (K, 1)
    # Fold quantize_deconv into the codebook gather: e_dec[k] = Wd @ e_k + bd.
    e_dec = e_f32 @ params.w_dconv.T + params.b_dconv[None, :]           # (K, C)
    g = jnp.concatenate([e_f32, e_dec], axis=1).T                        # (D+C, K) f32
    g_hi = g.astype(jnp.bfloat16)
    g_lo = (g - g_hi.astype(jnp.float32)).astype(jnp.bfloat16)           # f32 residual

    zq_all, xd_all, sse = fused_generator_call(
        x_all, wq, bq, e_bf16, e2, g_hi, g_lo, tile_lanes=tile_lanes)

    zq_src = zq_all[:bsz].reshape(bsz, d, h, w)
    zq_tgt = zq_all[bsz:].reshape(bsz, d, h, w)
    dec_src = xd_all[:bsz].reshape(bsz, c, h, w)
    dec_tgt = xd_all[bsz:].reshape(bsz, c, h, w)

    # Forward value of mean((sg[zq]-z)^2) + beta*mean((zq-sg[z])^2), summed over
    # the src and tgt branches (each normalized by B*D*H*W).
    # TODO(synk): straight-through / stop-gradient structure is forward-value
    # only; a custom_vjp would be needed for correct gradients.
    vq_loss = (1.0 + params.beta) * jnp.sum(sse) / jnp.float32(bsz * d * hw)

    # TODO(synk): hyperDecoder sub-module is not defined in the provided source;
    # it is identity on the deconv output, so style_fc(s_src/s_tgt) is dead and
    # the reconstructions collapse pairwise (src2tgt==src2src, tgt2src==tgt2tgt).
    del s_src, s_tgt
    rec_src2tgt = dec_src
    rec_src2src = dec_src
    rec_tgt2src = dec_tgt
    rec_tgt2tgt = dec_tgt
    return (rec_src2tgt, rec_tgt2src, rec_src2src, rec_tgt2tgt,
            zq_src, zq_tgt, vq_loss)


# -----------------------------------------------------------------------------
if __name__ == "__main__":
    B, C, H, W = 2, 8, 16, 16        # c_enc[-1] = c_dim = 8, HW = 256 (lane-dense)
    EMBED_DIM, N_EMBED = 8, 16
    STYLE_DIM, BETA = 8, 0.25

    key = jax.random.PRNGKey(0)
    kp, kx1, kx2, ks1, ks2 = jax.random.split(key, 5)
    params = GeneratorParams(kp, C, EMBED_DIM, N_EMBED, STYLE_DIM, BETA)

    x_src = jax.random.normal(kx1, (B, C, H, W), jnp.float32)
    x_tgt = jax.random.normal(kx2, (B, C, H, W), jnp.float32)
    s_src = jax.random.normal(ks1, (B, STYLE_DIM), jnp.float32)
    s_tgt = jax.random.normal(ks2, (B, STYLE_DIM), jnp.float32)

    fwd = jax.jit(functools.partial(generator_forward, params))
    outs = jax.block_until_ready(fwd(x_src, x_tgt, s_src, s_tgt))

    (rec_src2tgt, rec_tgt2src, rec_src2src, rec_tgt2tgt,
     zq_src, zq_tgt, vq_loss) = outs

    # Shape / finiteness checks.
    assert rec_src2tgt.shape == (B, C, H, W)
    assert rec_tgt2src.shape == (B, C, H, W)
    assert zq_src.shape == (B, EMBED_DIM, H, W)
    assert zq_tgt.shape == (B, EMBED_DIM, H, W)
    assert vq_loss.shape == ()
    assert bool(jnp.isfinite(vq_loss))

    # Structural checks (robust to bf16-induced argmin tie flips):
    # 1) every quantized vector must (near-)exactly equal some codebook row.
    zq_all_chk = jnp.concatenate([zq_src, zq_tgt], axis=0)               # (2B, D, H, W)
    zq_vec = jnp.moveaxis(zq_all_chk, 1, -1).reshape(-1, EMBED_DIM)      # (2B*HW, D)
    code_err = jnp.min(jnp.max(jnp.abs(zq_vec[:, None, :] - params.codebook[None]),
                               axis=-1), axis=-1)
    assert float(jnp.max(code_err)) < 1e-5
    # 2) the decoded output must equal quantize_deconv(zq).
    rec_ref = (jnp.einsum('cd,bdhw->bchw', params.w_dconv, zq_src,
                          precision=jax.lax.Precision.HIGHEST)
               + params.b_dconv[None, :, None, None])
    assert bool(jnp.allclose(rec_src2src, rec_ref, atol=1e-4))

    print("KERNEL_OK")
</pallas_src>

<mosaic_0001>
module attributes {stable_mosaic.version = 11 : i64} {
  func.func @_generator_fused_kernel(%arg0: i32, %arg1: i32, %arg2: memref<1x8x256xbf16, #tpu.memory_space<vmem>>, %arg3: memref<8x8xbf16, #tpu.memory_space<vmem>>, %arg4: memref<8x1xf32, #tpu.memory_space<vmem>>, %arg5: memref<16x8xbf16, #tpu.memory_space<vmem>>, %arg6: memref<16x1xf32, #tpu.memory_space<vmem>>, %arg7: memref<16x16xbf16, #tpu.memory_space<vmem>>, %arg8: memref<16x16xbf16, #tpu.memory_space<vmem>>, %arg9: memref<1x8x256xf32, #tpu.memory_space<vmem>>, %arg10: memref<1x8x256xf32, #tpu.memory_space<vmem>>, %arg11: memref<1x1x256xf32, #tpu.memory_space<vmem>>) attributes {dimension_semantics = [#tpu.dimension_semantics<parallel>, #tpu.dimension_semantics<parallel>], iteration_bounds = array<i64: 4, 1>, scalar_prefetch = 0 : i64, scratch_operands = 0 : i64, tpu.core_type = #tpu.core_type<tc>, window_params = [{transform_indices = @transform_0, window_bounds = array<i64: 1, 8, 256>}, {pipeline_mode = #tpu.pipeline_mode<synchronous>, transform_indices = @transform_1, window_bounds = array<i64: 8, 8>}, {pipeline_mode = #tpu.pipeline_mode<synchronous>, transform_indices = @transform_2, window_bounds = array<i64: 8, 1>}, {pipeline_mode = #tpu.pipeline_mode<synchronous>, transform_indices = @transform_3, window_bounds = array<i64: 16, 8>}, {pipeline_mode = #tpu.pipeline_mode<synchronous>, transform_indices = @transform_4, window_bounds = array<i64: 16, 1>}, {pipeline_mode = #tpu.pipeline_mode<synchronous>, transform_indices = @transform_5, window_bounds = array<i64: 16, 16>}, {pipeline_mode = #tpu.pipeline_mode<synchronous>, transform_indices = @transform_6, window_bounds = array<i64: 16, 16>}, {transform_indices = @transform_7, window_bounds = array<i64: 1, 8, 256>}, {transform_indices = @transform_8, window_bounds = array<i64: 1, 8, 256>}, {transform_indices = @transform_9, window_bounds = array<i64: 1, 1, 256>}]} {
    %c0 = arith.constant 0 : index
    %c0_0 = arith.constant 0 : index
    %c0_1 = arith.constant 0 : index
    %0 = vector.load %arg2[%c0, %c0_0, %c0_1] : memref<1x8x256xbf16, #tpu.memory_space<vmem>>, vector<1x8x256xbf16>
    %1 = vector.shape_cast %0 : vector<1x8x256xbf16> to vector<8x256xbf16>
    %c0_2 = arith.constant 0 : index
    %c0_3 = arith.constant 0 : index
    %2 = vector.load %arg3[%c0_2, %c0_3] : memref<8x8xbf16, #tpu.memory_space<vmem>>, vector<8x8xbf16>
    %cst = arith.constant dense<0.000000e+00> : vector<8x256xf32>
    %3 = tpu.matmul %2, %1, %cst {dimension_numbers = #tpu.dot_dimension_numbers<[1], [0], [0], [1], [0, 0, 1, 1], [], []>} : vector<8x8xbf16>, vector<8x256xbf16>, vector<8x256xf32> -> vector<8x256xf32>
    %c0_4 = arith.constant 0 : index
    %c0_5 = arith.constant 0 : index
    %4 = vector.load %arg4[%c0_4, %c0_5] : memref<8x1xf32, #tpu.memory_space<vmem>>, vector<8x1xf32>
    %5 = vector.broadcast %4 : vector<8x1xf32> to vector<8x256xf32>
    %6 = arith.addf %3, %5 : vector<8x256xf32>
    %c0_6 = arith.constant 0 : index
    %c0_7 = arith.constant 0 : index
    %7 = vector.load %arg5[%c0_6, %c0_7] : memref<16x8xbf16, #tpu.memory_space<vmem>>, vector<16x8xbf16>
    %8 = arith.truncf %6 : vector<8x256xf32> to vector<8x256xbf16>
    %cst_8 = arith.constant dense<0.000000e+00> : vector<16x256xf32>
    %9 = tpu.matmul %7, %8, %cst_8 {dimension_numbers = #tpu.dot_dimension_numbers<[1], [0], [0], [1], [0, 0, 1, 1], [], []>} : vector<16x8xbf16>, vector<8x256xbf16>, vector<16x256xf32> -> vector<16x256xf32>
    %c0_9 = arith.constant 0 : index
    %c0_10 = arith.constant 0 : index
    %10 = vector.load %arg6[%c0_9, %c0_10] : memref<16x1xf32, #tpu.memory_space<vmem>>, vector<16x1xf32>
    %cst_11 = arith.constant 2.000000e+00 : f32
    %11 = vector.broadcast %cst_11 : f32 to vector<16x256xf32>
    %12 = arith.mulf %11, %9 : vector<16x256xf32>
    %13 = vector.broadcast %10 : vector<16x1xf32> to vector<16x256xf32>
    %14 = arith.subf %13, %12 : vector<16x256xf32>
    %cst_12 = arith.constant dense<0x7F800000> : vector<256xf32>
    %15 = vector.multi_reduction <minimumf>, %14, %cst_12 [0] : vector<16x256xf32> to vector<256xf32>
    %16 = vector.shape_cast %15 : vector<256xf32> to vector<1x256xf32>
    %17 = tpu.iota {dimensions = array<i32: 0>} : vector<16x256xi32>
    %18 = vector.broadcast %16 : vector<1x256xf32> to vector<16x256xf32>
    %19 = arith.cmpf ole, %14, %18 : vector<16x256xf32>
    %c16_i32 = arith.constant 16 : i32
    %20 = vector.broadcast %c16_i32 : i32 to vector<16x256xi32>
    %21 = arith.select %19, %17, %20 : vector<16x256xi1>, vector<16x256xi32>
    %cst_13 = arith.constant dense<2147483647> : vector<256xi32>
    %22 = vector.multi_reduction <minsi>, %21, %cst_13 [0] : vector<16x256xi32> to vector<256xi32>
    %23 = vector.shape_cast %22 : vector<256xi32> to vector<1x256xi32>
    %24 = vector.broadcast %23 : vector<1x256xi32> to vector<16x256xi32>
    %25 = arith.cmpi eq, %17, %24 : vector<16x256xi32>
    %26 = arith.extui %25 : vector<16x256xi1> to vector<16x256xi32>
    %27 = arith.sitofp %26 : vector<16x256xi32> to vector<16x256xf32>
    %28 = arith.truncf %27 : vector<16x256xf32> to vector<16x256xbf16>
    %c0_14 = arith.constant 0 : index
    %c0_15 = arith.constant 0 : index
    %29 = vector.load %arg7[%c0_14, %c0_15] : memref<16x16xbf16, #tpu.memory_space<vmem>>, vector<16x16xbf16>
    %cst_16 = arith.constant dense<0.000000e+00> : vector<16x256xf32>
    %30 = tpu.matmul %29, %28, %cst_16 {dimension_numbers = #tpu.dot_dimension_numbers<[1], [0], [0], [1], [0, 0, 1, 1], [], []>} : vector<16x16xbf16>, vector<16x256xbf16>, vector<16x256xf32> -> vector<16x256xf32>
    %c0_17 = arith.constant 0 : index
    %c0_18 = arith.constant 0 : index
    %31 = vector.load %arg8[%c0_17, %c0_18] : memref<16x16xbf16, #tpu.memory_space<vmem>>, vector<16x16xbf16>
    %cst_19 = arith.constant dense<0.000000e+00> : vector<16x256xf32>
    %32 = tpu.matmul %31, %28, %cst_19 {dimension_numbers = #tpu.dot_dimension_numbers<[1], [0], [0], [1], [0, 0, 1, 1], [], []>} : vector<16x16xbf16>, vector<16x256xbf16>, vector<16x256xf32> -> vector<16x256xf32>
    %33 = arith.addf %30, %32 : vector<16x256xf32>
    %34 = vector.extract_strided_slice %33 {offsets = [0, 0], sizes = [8, 256], strides = [1, 1]} : vector<16x256xf32> to vector<8x256xf32>
    %c0_20 = arith.constant 0 : index
    %c0_21 = arith.constant 0 : index
    %c0_22 = arith.constant 0 : index
    %35 = vector.load %arg9[%c0_20, %c0_21, %c0_22] : memref<1x8x256xf32, #tpu.memory_space<vmem>>, vector<1x8x256xf32>
    %36 = vector.shape_cast %35 : vector<1x8x256xf32> to vector<8x256xf32>
    %37 = vector.shape_cast %34 : vector<8x256xf32> to vector<1x8x256xf32>
    tpu.vector_store %arg9[%c0_20, %c0_21, %c0_22], %37 {strides = array<i32>} : memref<1x8x256xf32, #tpu.memory_space<vmem>>, vector<1x8x256xf32>,
    %38 = vector.extract_strided_slice %33 {offsets = [8, 0], sizes = [8, 256], strides = [1, 1]} : vector<16x256xf32> to vector<8x256xf32>
    %c0_23 = arith.constant 0 : index
    %c0_24 = arith.constant 0 : index
    %c0_25 = arith.constant 0 : index
    %39 = vector.load %arg10[%c0_23, %c0_24, %c0_25] : memref<1x8x256xf32, #tpu.memory_space<vmem>>, vector<1x8x256xf32>
    %40 = vector.shape_cast %39 : vector<1x8x256xf32> to vector<8x256xf32>
    %41 = vector.shape_cast %38 : vector<8x256xf32> to vector<1x8x256xf32>
    tpu.vector_store %arg10[%c0_23, %c0_24, %c0_25], %41 {strides = array<i32>} : memref<1x8x256xf32, #tpu.memory_space<vmem>>, vector<1x8x256xf32>,
    %42 = arith.subf %34, %6 : vector<8x256xf32>
    %43 = arith.mulf %42, %42 : vector<8x256xf32>
    %cst_26 = arith.constant dense<0.000000e+00> : vector<256xf32>
    %44 = vector.multi_reduction <add>, %43, %cst_26 [0] : vector<8x256xf32> to vector<256xf32>
    %45 = vector.shape_cast %44 : vector<256xf32> to vector<1x256xf32>
    %c0_27 = arith.constant 0 : index
    %c0_28 = arith.constant 0 : index
    %c0_29 = arith.constant 0 : index
    %46 = vector.load %arg11[%c0_27, %c0_28, %c0_29] : memref<1x1x256xf32, #tpu.memory_space<vmem>>, vector<1x1x256xf32>
    %47 = vector.shape_cast %46 : vector<1x1x256xf32> to vector<1x256xf32>
    %48 = vector.shape_cast %45 : vector<1x256xf32> to vector<1x1x256xf32>
    tpu.vector_store %arg11[%c0_27, %c0_28, %c0_29], %48 {strides = array<i32>} : memref<1x1x256xf32, #tpu.memory_space<vmem>>, vector<1x1x256xf32>,
    return
  }
  func.func @transform_0(%arg0: i32, %arg1: i32) -> (i32, i32, i32) {
    %c0_i32 = arith.constant 0 : i32
    %c0_i32_0 = arith.constant 0 : i32
    return %arg0, %c0_i32, %arg1 : i32, i32, i32
  }
  func.func @transform_1(%arg0: i32, %arg1: i32) -> (i32, i32) {
    %c0_i32 = arith.constant 0 : i32
    %c0_i32_0 = arith.constant 0 : i32
    %c0_i32_1 = arith.constant 0 : i32
    return %c0_i32, %c0_i32_0 : i32, i32
  }
  func.func @transform_2(%arg0: i32, %arg1: i32) -> (i32, i32) {
    %c0_i32 = arith.constant 0 : i32
    %c0_i32_0 = arith.constant 0 : i32
    %c0_i32_1 = arith.constant 0 : i32
    return %c0_i32, %c0_i32_0 : i32, i32
  }
  func.func @transform_3(%arg0: i32, %arg1: i32) -> (i32, i32) {
    %c0_i32 = arith.constant 0 : i32
    %c0_i32_0 = arith.constant 0 : i32
    %c0_i32_1 = arith.constant 0 : i32
    return %c0_i32, %c0_i32_0 : i32, i32
  }
  func.func @transform_4(%arg0: i32, %arg1: i32) -> (i32, i32) {
    %c0_i32 = arith.constant 0 : i32
    %c0_i32_0 = arith.constant 0 : i32
    %c0_i32_1 = arith.constant 0 : i32
    return %c0_i32, %c0_i32_0 : i32, i32
  }
  func.func @transform_5(%arg0: i32, %arg1: i32) -> (i32, i32) {
    %c0_i32 = arith.constant 0 : i32
    %c0_i32_0 = arith.constant 0 : i32
    %c0_i32_1 = arith.constant 0 : i32
    return %c0_i32, %c0_i32_0 : i32, i32
  }
  func.func @transform_6(%arg0: i32, %arg1: i32) -> (i32, i32) {
    %c0_i32 = arith.constant 0 : i32
    %c0_i32_0 = arith.constant 0 : i32
    %c0_i32_1 = arith.constant 0 : i32
    return %c0_i32, %c0_i32_0 : i32, i32
  }
  func.func @transform_7(%arg0: i32, %arg1: i32) -> (i32, i32, i32) {
    %c0_i32 = arith.constant 0 : i32
    %c0_i32_0 = arith.constant 0 : i32
    return %arg0, %c0_i32, %arg1 : i32, i32, i32
  }
  func.func @transform_8(%arg0: i32, %arg1: i32) -> (i32, i32, i32) {
    %c0_i32 = arith.constant 0 : i32
    %c0_i32_0 = arith.constant 0 : i32
    return %arg0, %c0_i32, %arg1 : i32, i32, i32
  }
  func.func @transform_9(%arg0: i32, %arg1: i32) -> (i32, i32, i32) {
    %c0_i32 = arith.constant 0 : i32
    %c0_i32_0 = arith.constant 0 : i32
    return %arg0, %c0_i32, %arg1 : i32, i32, i32
  }
}

</mosaic_0001>

<bundles_post_ra>
// kernel: generator_forward.1
= control target key start
LH: loop header
LB: loop body
LE: loop exit
PB: predicated region body
PF: predicated region fallthrough
CT: control target
= control target key end

     0   :  { %s1111_s30 = smov 0   ;;  %s1113_s10 = smov 0   ;;  %s1208_s0 = inlined_call_operand.vmem [shape: bf16[4,8,256], index: 0, kind: input, shape index: {}]   ;;  %s1209_s1 = inlined_call_operand.vmem [shape: bf16[8,8], index: 1, kind: input, shape index: {}]   ;;  %s1210_s2 = inlined_call_operand.vmem [shape: f32[8,1], index: 2, kind: input, shape index: {}]   ;;  %s1211_s3 = inlined_call_operand.vmem [shape: bf16[16,8], index: 3, kind: input, shape index: {}]   ;;  %s1212_s4 = inlined_call_operand.vmem [shape: f32[16,1], index: 4, kind: input, shape index: {}]   ;;  %s1213_s5 = inlined_call_operand.vmem [shape: bf16[16,16], index: 5, kind: input, shape index: {}]   ;;  %s1214_s6 = inlined_call_operand.vmem [shape: bf16[16,16], index: 6, kind: input, shape index: {}]   ;;  %s1215_s7 = inlined_call_operand.vmem [shape: f32[4,8,256], index: 7, kind: output, shape index: {0}]   ;;  %s1216_s8 = inlined_call_operand.vmem [shape: f32[4,8,256], index: 8, kind: output, shape index: {1}]   ;;  %s1217_s9 = inlined_call_operand.vmem [shape: f32[4,1,256], index: 9, kind: output, shape index: {2}]  }
   0x1   :  { %s1115_s11 = smov 0  }
   0x2 LB: > { %s32_s12 = sadd.s32 1, %s1052_s10  ;;  %p960_p0 = scmp.ge.s32.totalorder %s1056_s11, 1  ;;  %s1056_s11 = sphi %s1115_s11, %s20_s11   ;;  %s1052_s10 = sphi %s1113_s10, %s1219_s10   ;;  %s1048_s30 = sphi %s1111_s30, %s1218_s30  }
   0x3   : > { %p34_p1 = scmp.ge.s32.totalorder %s32_s12, 4  ;;  %p317_p2 = scmp.lt.s32.totalorder %s1056_s11, 5 }
   0x5   : > { %s1221_s12 = smov (%p34_p1, %s32_s12), 0  ;;  %p318_p3 = pnand %p960_p0, %p317_p2 }
   0x6   : > { %p379_p4 = scmp.lt.s32.totalorder (!%p318_p3), %s1048_s30, 3  ;;  %v1058_v0 = vmov (!%p318_p3), 0   ;;  %v420_v1 = vld [vmem:[%s1210_s2] sm:$0xff] (!%p318_p3)  ;;  %vm435_vm0 = vcmask (!%p318_p3), 1043456   ;;  %vm431_vm1 = vcmask (!%p318_p3), 64512   ;;  %v545_v8 = vld [vmem:[%s1212_s4 + $0x8] sm:$0xff] (!%p318_p3)  ;;  %v578_v37 = vlaneseq (!%p318_p3) }
   0x7   : > { %321 = sbr.rel (%p318_p3) target bundleno = 748 (0x2ec), region = 48  ;;  %474 = vmatprep.mubr.bf16.mxu1 (!%p318_p3), %v1058_v0  ;;  %1027 = vset.pattern.permute.xlu0 (!%p318_p3), %v1058_v0  ;;  %v544_v2 = vld [vmem:[%s1212_s4] sm:$0xff] (!%p318_p3) }
   0x8   : > { %423 = vperm.xlu0 (!%p318_p3), %1027, %v420_v1   ;;  %1028 = vset.pattern.permute.xlu1 (!%p318_p3), %v1058_v0  ;;  %v419_v7 = vld [vmem:[%s1209_s1] sm:$0xf] (!%p318_p3)  ;;  %v1170_v42 = vshrl.u32 (!%p318_p3), %v578_v37, 7 }
   0x9   : > { %670 = vmatprep.mubr.bf16.mxu0 (!%p318_p3), %v1058_v0  ;;  %557 = vperm.xlu1 (!%p318_p3), %1028, %v545_v8   ;;  %v1031_v19 = vld [vmem:[%s1211_s3] sm:$0xff] (!%p318_p3)  }
   0xa   : > { %v580_v47 = vadd.s32 (!%p318_p3), 8, %v1170_v42  ;;  %v1033_v8 = vld [vmem:[%s1213_s5] sm:$0xff] (!%p318_p3)  }
   0xc   : > { %552 = vperm.xlu0 (!%p318_p3), %1027, %v544_v2  }
   0xe   : > { %s1223_s30 = smov (!%p379_p4, %s1048_s30), 3 }
   0xf   : > { %s993_s17 = sshll.u32 %s1223_s30, 3  ;;  %s994_s14 = sshll.u32 %s1223_s30, 4 }
  0x10   : > { %s386_s20 = scalar_lea.vmem %s1208_s0, %s993_s17  ;;  %s396_s17 = scalar_lea.vmem %s1215_s7, %s994_s14 }
  0x11   : > { %v418_v3 = vld [vmem:[%s386_s20] sm:$0xff]  ;;  %s406_s20 = scalar_lea.vmem %s1216_s8, %s994_s14  ;;  %s967_s21 = sshll.u32 %s1223_s30, 1 }
  0x12   : > { %v969_v4 = vcombine.high %v418_v3, %v418_v3  ;;  %v968_v5 = vcombine.low %v418_v3, %v418_v3  ;;  %s415_s24 = scalar_lea.vmem %s1217_s9, %s967_s21 }
  0x14   : > { %970 = vmatprep.subr.msk.bf16.mxu1 %vm435_vm0, %v969_v4  ;;  %v437_v6 = vsel %vm435_vm0, %v968_v5, 0 }
  0x15   : > { %443 = vmatpush1.bf16.msra.mxu1 %v437_v6  ;;  %v1059_v6 = vmov 1.0|1.0  }
  0x18   : > { %971 = vmatmul.mubr.msk.bf16.vlgmr.msra.gmra.mrb[0].mxu1 %vm431_vm1, %v419_v7  ;;  %v1032_v7 = vld [vmem:[%s1214_s6] sm:$0xff]  }
  0x19   : > { %533 = vmatprep.mubr.bf16.mxu1 %v1058_v0 }
  0x87   : > { %v424_v9 = vpop.permute.xlu0 %423 }
  0x88   : > { %v558_v25 = vpop.permute.xlu1 %557 }
  0x8b   : > { %v553_v28 = vpop.permute.xlu0 %552 }
  0xeb   : > { %v476_v10 = vpop.f32.mrb[0].mxu1 }
  0xec   : > { %v1155_v11 = vadd.f32 %v476_v10, %v424_v9  ;;  %v478_v12 = vpop.f32.mrb[1].mxu1 }
  0xed   : > { %v1157_v13 = vadd.f32 %v478_v12, %v424_v9  ;;  %v480_v14 = vpop.f32.mrb[2].mxu1 }
  0xee   : > { %v485_v15 = vpack.c.bf16 %v1155_v11, %v1155_v11  ;;  %v481_v16 = vpop.f32.mrb[3].mxu1 }
  0xef   : > { %v486_v17 = vpack.c.bf16 %v1157_v13, %v1157_v13 }
  0xf0   : > { %v496_v18 = vsel %vm435_vm0, %v485_v15, 0 }
  0xf1   : > { %973 = vmatprep.subr.msk.bf16.mxu1 %vm435_vm0, %v486_v17 }
  0xf2   : > { %502 = vmatpush1.bf16.msra.mxu1 %v496_v18 }
  0xf5   : > { %974 = vmatmul.mubr.msk.bf16.vlgmr.msra.gmra.mrb[4].mxu1 %vm431_vm1, %v1031_v19 }
 0x1c8   : > { %v535_v20 = vpop.f32.mrb[4].mxu1 }
 0x1c9   : > { %v546_v21 = vmul.f32 2.0, %v535_v20  ;;  %v537_v22 = vpop.f32.mrb[5].mxu1 }
 0x1ca   : > { %v547_v23 = vmul.f32 2.0, %v537_v22  ;;  %v539_v24 = vpop.f32.mrb[6].mxu1  ;;  %v1060_v22 = vmov 1966171168  }
 0x1cb   : > { %v548_v26 = vmul.f32 2.0, %v539_v24  ;;  %v541_v27 = vpop.f32.mrb[7].mxu1  ;;  %v560_v30 = vsub.f32 %v553_v28, %v546_v21 }
 0x1cc   : > { %v549_v29 = vmul.f32 2.0, %v541_v27  ;;  %v561_v32 = vsub.f32 %v553_v28, %v547_v23  ;;  %v756_v23 = vunpack.c.l.s4 %v1060_v22 }
 0x1cd   : > { %v562_v31 = vsub.f32 %v558_v25, %v548_v26 }
 0x1ce   : > { %v563_v33 = vsub.f32 %v558_v25, %v549_v29  ;;  %v757_v27 = vunpack.c.0.s8 %v756_v23 }
 0x1cf   : > { %v564_v34 = vmin.f32 %v560_v30, %v562_v31 }
 0x1d0   : > { %v571_v35 = vmin.f32 %v561_v32, %v563_v33 }
 0x1d1   : > { %v565_v36 = vrot.slane %v564_v34, 4 }
 0x1d2   : > { %v572_v38 = vrot.slane %v571_v35, 4 }
 0x1d3   : > { %v566_v39 = vmin.f32 %v564_v34, %v565_v36 }
 0x1d4   : > { %v573_v40 = vmin.f32 %v571_v35, %v572_v38 }
 0x1d5   : > { %v567_v41 = vrot.slane %v566_v39, 2 }
 0x1d6   : > { %v574_v43 = vrot.slane %v573_v40, 2 }
 0x1d7   : > { %v568_v44 = vmin.f32 %v566_v39, %v567_v41 }
 0x1d8   : > { %v575_v45 = vmin.f32 %v573_v40, %v574_v43 }
 0x1d9   : > { %v569_v46 = vrot.slane %v568_v44, 1 }
 0x1da   : > { %v576_v48 = vrot.slane %v575_v45, 1 }
 0x1db   : > { %v570_v49 = vmin.f32 %v568_v44, %v569_v46 }
 0x1dc   : > { %v577_v50 = vmin.f32 %v575_v45, %v576_v48 }
 0x1dd   : > { %vm581_vm2 = vcmp.le.f32.partialorder %v560_v30, %v570_v49  ;;  %vm583_vm3 = vcmp.le.f32.partialorder %v562_v31, %v570_v49  ;;  %v760_v31 = vsub.s32 %v757_v27, %v1170_v42 }
 0x1de   : > { %vm582_vm4 = vcmp.le.f32.partialorder %v561_v32, %v577_v50  ;;  %vm584_vm5 = vcmp.le.f32.partialorder %v563_v33, %v577_v50  ;;  %v585_v51 = vsel %vm581_vm2, %v1170_v42, 16  ;;  %v587_v52 = vsel %vm583_vm3, %v580_v47, 16 }
 0x1df   : > { %v586_v53 = vsel %vm582_vm4, %v1170_v42, 16  ;;  %v588_v54 = vsel %vm584_vm5, %v580_v47, 16  ;;  %vm589_vm6 = vcmp.lt.s32.totalorder %v585_v51, %v587_v52  ;;  %vm634_vm4 = vcmask 130048  }
 0x1e0   : > { %v590_v55 = vsel %vm589_vm6, %v585_v51, %v587_v52  ;;  %vm600_vm7 = vcmp.lt.s32.totalorder %v586_v53, %v588_v54  ;;  %vm772_vm5 = vcmp.lt.s32.totalorder %v578_v37, 256 }
 0x1e1   : > { %v591_v56 = vrot.slane %v590_v55, 4  ;;  %v601_v57 = vsel %vm600_vm7, %v586_v53, %v588_v54 }
 0x1e2   : > { %v602_v58 = vrot.slane %v601_v57, 4 }
 0x1e3   : > { %vm592_vm8 = vcmp.lt.s32.totalorder %v590_v55, %v591_v56 }
 0x1e4   : > { %v593_v59 = vsel %vm592_vm8, %v590_v55, %v591_v56  ;;  %vm603_vm9 = vcmp.lt.s32.totalorder %v601_v57, %v602_v58 }
 0x1e5   : > { %v604_v60 = vsel %vm603_vm9, %v601_v57, %v602_v58  ;;  %v594_v61 = vrot.slane %v593_v59, 2 }
 0x1e6   : > { %v605_v62 = vrot.slane %v604_v60, 2 }
 0x1e7   : > { %vm595_vm10 = vcmp.lt.s32.totalorder %v593_v59, %v594_v61 }
 0x1e8   : > { %vm606_vm11 = vcmp.lt.s32.totalorder %v604_v60, %v605_v62  ;;  %v596_v63 = vsel %vm595_vm10, %v593_v59, %v594_v61 }
 0x1e9   : > { %v607_v1 = vsel %vm606_vm11, %v604_v60, %v605_v62  ;;  %v597_v2 = vrot.slane %v596_v63, 1 }
 0x1ea   : > { %v608_v3 = vrot.slane %v607_v1, 1 }
 0x1eb   : > { %vm598_vm12 = vcmp.lt.s32.totalorder %v596_v63, %v597_v2 }
 0x1ec   : > { %vm609_vm13 = vcmp.lt.s32.totalorder %v607_v1, %v608_v3  ;;  %v599_v4 = vsel %vm598_vm12, %v596_v63, %v597_v2 }
 0x1ed   : > { %v610_v5 = vsel %vm609_vm13, %v607_v1, %v608_v3  ;;  %vm611_vm14 = vcmp.eq.s32.totalorder %v1170_v42, %v599_v4  ;;  %vm613_vm15 = vcmp.eq.s32.totalorder %v580_v47, %v599_v4 }
 0x1ee   : > { %vm612_vm0 = vcmp.eq.s32.totalorder %v1170_v42, %v610_v5  ;;  %vm614_vm1 = vcmp.eq.s32.totalorder %v580_v47, %v610_v5  ;;  %vm982_vm3 = vmpackc.low %vm613_vm15, %vm611_vm14 }
 0x1ef   : > { %vm980_vm2 = vmpackc.low %vm614_vm1, %vm612_vm0 }
 0x1f0   : > { %981 = vmatprep.subr.msk.bf16.mxu0 %vm980_vm2, %v1059_v6 }
 0x1f1   : > { %983 = vmatpush1.bf16.msk.msra.mxu0 %vm982_vm3, %v1059_v6 }
 0x1f2   : > { %987 = vmatprep.subr.msk.bf16.mxu0 %vm980_vm2, %v1059_v6 }
 0x1f4   : > { %984 = vmatmul.mubr.msk.bf16.vlgmr.msra.gmra.mrb[0].mxu0 %vm634_vm4, %v1032_v7 }
 0x1f5   : > { %989 = vmatpush1.bf16.msk.msra.mxu0 %vm982_vm3, %v1059_v6  ;;  %721 = vmatprep.mubr.bf16.mxu0 %v1058_v0 }
 0x200   : > { %990 = vmatmul.mubr.msk.bf16.vlgmr.msra.gmra.mrb[0].mxu0 %vm634_vm4, %v1033_v8 }
 0x2d3   : > { %v723_v9 = vpop.f32.mrb[0].mxu0 }
 0x2d4   : > { %732 = vst [vmem:[%s396_s17] sm:$0xff] %v723_v9  ;;  %v736_v10 = vsub.f32 %v723_v9, %v1155_v11  ;;  %v725_v12 = vpop.f32.mrb[1].mxu0 }
 0x2d5   : > { %733 = vst [vmem:[%s396_s17 + $0x8] sm:$0xff] %v725_v12  ;;  %v737_v0 = vsub.f32 %v725_v12, %v1157_v13  ;;  %v727_v14 = vpop.f32.mrb[2].mxu0 }
 0x2d6   : > { %v738_v15 = vmul.f32 %v736_v10, %v736_v10  ;;  %734 = vst [vmem:[%s406_s20] sm:$0xff] %v727_v14  ;;  %v729_v16 = vpop.f32.mrb[3].mxu0 }
 0x2d7   : > { %v739_v17 = vmul.f32 %v737_v0, %v737_v0  ;;  %735 = vst [vmem:[%s406_s20 + $0x8] sm:$0xff] %v729_v16 }
 0x2d8   : > { %v740_v18 = vrot.slane %v738_v15, 4 }
 0x2d9   : > { %v746_v19 = vrot.slane %v739_v17, 4 }
 0x2da   : > { %v741_v20 = vadd.f32 %v740_v18, %v738_v15 }
 0x2db   : > { %v747_v21 = vadd.f32 %v746_v19, %v739_v17 }
 0x2dc   : > { %v742_v24 = vrot.slane %v741_v20, 2 }
 0x2dd   : > { %v748_v25 = vrot.slane %v747_v21, 2 }
 0x2de   : > { %v743_v11 = vadd.f32 %v742_v24, %v741_v20 }
 0x2df   : > { %v749_v26 = vadd.f32 %v748_v25, %v747_v21 }
 0x2e0   : > { %v744_v28 = vrot.slane %v743_v11, 1 }
 0x2e1   : > { %v750_v13 = vrot.slane %v749_v26, 1 }
 0x2e2   : > { %v745_v29 = vadd.f32 %v744_v28, %v743_v11 }
 0x2e3   : > { %v751_v30 = vadd.f32 %v750_v13, %v749_v26 }
 0x2e5   : > { %v754_v32 = vcombine.low %v745_v29, %v751_v30 }
 0x2e7   : > { %v761_v33 = vrot.slane %v754_v32, %v760_v31 }
 0x2e9   : > { %v768_v34 = vrot.slane %v761_v33, %v760_v31 }
 0x2eb   : > { %774 = vst.msk [vmem:[%s415_s24] sm:$0x3] %vm772_vm5, %v768_v34 }
 0x2ec PF: > { %s20_s11 = sadd.s32 1, %s1056_s11   ;;  %s1218_s30 = smov %s1052_s10 }
 0x2ed   : > { %p17_p5 = scmp.ge.s32.totalorder %s20_s11, 6   ;;  %s1219_s10 = smov %s1221_s12 }
 0x2ef   :  { %19 = sbr.rel (!%p17_p5) target bundleno = 2 (0x2), region = 102 }

</bundles_post_ra>
